<compile_context>
chip_gen: v5e
topology: v5e:2x2
jax: 0.10.0
libtpu: 0.0.40
codegen_flags: <defaults>
</compile_context>

<pallas_src>
import functools

import jax
import jax.numpy as jnp
from jax.experimental import pallas as pl
from jax.experimental.pallas import tpu as pltpu

# Constants sized for the 16x16 example input; AdaptiveMaxPool2d(8) on a 16x16
# feature map is exactly MaxPool2d(kernel=2, stride=2).
CIN, COUT = 3, 16
CINP = 8                                 # channel dim padded to one sublane group
KH = KW = 3
PAD = 1
H = W = 16
HP, WP = H + 2 * PAD, W + 2 * PAD        # 18, 18  padded spatial
L = HP * WP                              # 324     flattened padded spatial
LP = 384                                 # per-image lane block (3 full vregs)
SHIFT_MAX = (KH - 1) * WP + (KW - 1)     # 38      largest tap shift
LEXT = 448                               # input flat length (>= LP+SHIFT_MAX, mult of 128)
HO = WO = 8                              # pooled output
NPOOL = HO * WO                          # 64
KPAD = KH * KW * CINP                    # 72      packed K (sublane-aligned tap groups)


def net_kernel(x_ref, w_ref, b_ref, sel_ref, o_ref, patch_ref, *, nb):
    # x_ref:     (nb, CINP, LEXT)            padded + flattened inputs for this step
    # w_ref:     (COUT, KPAD)                packed conv weights (zeros in pad channels)
    # b_ref:     (COUT, 1)                   conv bias
    # sel_ref:   (nb*LP - 1 - WP, nb*NPOOL)  one-hot pool decimation + batch fold
    # o_ref:     (1, COUT, nb*NPOOL)         lane-dense output block
    # patch_ref: (KPAD, nb*LP)               VMEM scratch for the im2col slab
    for b in range(nb):
        xb = x_ref[b]                                   # (CINP, LEXT)
        base = b * LP
        for kh in range(KH):
            for kw in range(KW):
                s = kh * WP + kw
                r0 = (kh * KW + kw) * CINP
                # 8-row, 128-lane-aligned, 384-wide store -> unmasked vst.
                patch_ref[r0:r0 + CINP, base:base + LP] = xb[:, s:s + LP]

    # Conv as ONE (16, 72) x (72, nb*384) MXU matmul; batch+spatial on the lane axis.
    acc = jnp.dot(w_ref[...], patch_ref[...],
                  preferred_element_type=jnp.float32)   # (COUT, nb*LP)
    acc = jnp.maximum(acc + b_ref[...], 0.0)            # bias + first ReLU

    # MaxPool2d(2,2): pairwise maxes of shifted lane-slices.  Cross-image "bleed" only
    # lands in columns that sel never selects (selected cols use offsets <= 285 < 384).
    wt = nb * LP
    mw = jnp.maximum(acc[:, :wt - 1], acc[:, 1:])       # cols (w, w+1)
    mh = jnp.maximum(mw[:, :wt - 1 - WP], mw[:, WP:])   # rows (h, h+1)

    # One-hot decimation matmul picks the pooled lanes and folds the nb images into a
    # lane-dense (16, nb*64) slab -> single store, no concatenate, no XLU shuffles.
    pooled = jnp.dot(mh, sel_ref[...],
                     preferred_element_type=jnp.float32)  # (COUT, nb*NPOOL)
    # Second ReLU elided: pooled is a max over already-ReLU'd values, provably >= 0.
    o_ref[0] = pooled


def net_forward(x_nchw, w_oihw, bias, images_per_step=None):
    n, cin, h, w = x_nchw.shape
    assert (cin, h, w) == (CIN, H, W), "kernel specialized to 3x16x16 inputs"

    # Images folded into one grid step.  v5e/v6e (single TC): fold everything.
    # On v7x pass images_per_step=ceil(n/2) to keep a 2-step "parallel" grid (one
    # half-batch per TensorCore).
    nb = images_per_step if images_per_step is not None else min(n, 8)
    n_pad = (-n) % nb
    npad = n + n_pad
    ng = npad // nb

    # Wrapper-side layout plumbing: pad channels 3->8 (sublane group), zero-pad
    # spatially, flatten, pad the flat lane dim to LEXT (multiple of 128).
    x = x_nchw.astype(jnp.float32)
    x = jnp.pad(x, ((0, n_pad), (0, CINP - CIN), (PAD, PAD), (PAD, PAD)))
    xe = jnp.pad(x.reshape(npad, CINP, L), ((0, 0), (0, 0), (0, LEXT - L)))

    # Weights packed lane-dense and sublane-grouped: (co, kh, kw, ci_pad8) -> (16, 72).
    wt_ = jnp.transpose(w_oihw.astype(jnp.float32), (0, 2, 3, 1))       # (16,3,3,3)
    wt_ = jnp.pad(wt_, ((0, 0), (0, 0), (0, 0), (0, CINP - CIN)))       # (16,3,3,8)
    wpk = wt_.reshape(COUT, KPAD)
    b2 = bias.astype(jnp.float32).reshape(COUT, 1)

    # One-hot decimation matrix: column (b*64 + ho*8 + wo) selects row b*LP + 2*ho*WP + 2*wo.
    lm = nb * LP - 1 - WP
    p = jnp.arange(lm, dtype=jnp.int32)[:, None]
    col = jnp.arange(nb * NPOOL, dtype=jnp.int32)[None, :]
    bi, j = col // NPOOL, col % NPOOL
    target = bi * LP + (j // WO) * (2 * WP) + (j % WO) * 2
    sel = (p == target).astype(jnp.float32)                             # (lm, nb*64)

    out = pl.pallas_call(
        functools.partial(net_kernel, nb=nb),
        out_shape=jax.ShapeDtypeStruct((ng, COUT, nb * NPOOL), jnp.float32),
        grid=(ng,),
        in_specs=[
            pl.BlockSpec((nb, CINP, LEXT), lambda g: (g, 0, 0)),
            pl.BlockSpec((COUT, KPAD), lambda g: (0, 0)),
            pl.BlockSpec((COUT, 1), lambda g: (0, 0)),
            pl.BlockSpec((lm, nb * NPOOL), lambda g: (0, 0)),
        ],
        out_specs=pl.BlockSpec((1, COUT, nb * NPOOL), lambda g: (g, 0, 0)),
        scratch_shapes=[pltpu.VMEM((KPAD, nb * LP), jnp.float32)],
        compiler_params=pltpu.CompilerParams(dimension_semantics=("parallel",)),
    )(xe, wpk, b2, sel)

    # (ng, 16, nb*64) -> (n, 16, 8, 8): lane col b*64+j holds image (g*nb+b), pool pos j.
    out = out.reshape(ng, COUT, nb, NPOOL).transpose(0, 2, 1, 3)
    return out.reshape(npad, COUT, HO, WO)[:n]


def _reference(x_nchw, w_oihw, bias):
    # Pure-JAX reference: relu(conv) -> adaptive max pool to 8x8 (== 2x2/2) -> relu.
    y = jax.lax.conv_general_dilated(
        x_nchw, w_oihw, window_strides=(1, 1),
        padding=((PAD, PAD), (PAD, PAD)),
        dimension_numbers=("NCHW", "OIHW", "NCHW"))
    y = jnp.maximum(y + bias.reshape(1, -1, 1, 1), 0.0)
    n, c, hh, ww = y.shape
    y = y.reshape(n, c, hh // 2, 2, ww // 2, 2).max(axis=(3, 5))
    return jnp.maximum(y, 0.0)


if __name__ == "__main__":
    key = jax.random.PRNGKey(0)
    k_x, k_w, k_b = jax.random.split(key, 3)

    N = 2
    x = jax.random.normal(k_x, (N, CIN, H, W), dtype=jnp.float32)
    # Deterministic Conv2d-like uniform fan-in init.
    fan_in = CIN * KH * KW
    bound = 1.0 / (fan_in ** 0.5)
    wgt = jax.random.uniform(k_w, (COUT, CIN, KH, KW), jnp.float32, -bound, bound)
    b = jax.random.uniform(k_b, (COUT,), jnp.float32, -bound, bound)

    out = net_forward(x, wgt, b)
    out = jax.block_until_ready(out)

    ref = _reference(x, wgt, b)
    assert out.shape == (N, COUT, HO, WO)
    assert jnp.allclose(out, ref, atol=1e-4, rtol=1e-4)

    print("KERNEL_OK")
</pallas_src>

<mosaic_0001>
module attributes {stable_mosaic.version = 11 : i64} {
  func.func @net_kernel(%arg0: i32, %arg1: memref<2x8x448xf32, #tpu.memory_space<vmem>>, %arg2: memref<16x72xf32, #tpu.memory_space<vmem>>, %arg3: memref<16x1xf32, #tpu.memory_space<vmem>>, %arg4: memref<749x128xf32, #tpu.memory_space<vmem>>, %arg5: memref<1x16x128xf32, #tpu.memory_space<vmem>>, %arg6: memref<72x768xf32, #tpu.memory_space<vmem>>) attributes {dimension_semantics = [#tpu.dimension_semantics<parallel>], iteration_bounds = array<i64: 1>, scalar_prefetch = 0 : i64, scratch_operands = 1 : i64, tpu.core_type = #tpu.core_type<tc>, window_params = [{transform_indices = @transform_0, window_bounds = array<i64: 2, 8, 448>}, {pipeline_mode = #tpu.pipeline_mode<synchronous>, transform_indices = @transform_1, window_bounds = array<i64: 16, 72>}, {pipeline_mode = #tpu.pipeline_mode<synchronous>, transform_indices = @transform_2, window_bounds = array<i64: 16, 1>}, {pipeline_mode = #tpu.pipeline_mode<synchronous>, transform_indices = @transform_3, window_bounds = array<i64: 749, 128>}, {transform_indices = @transform_4, window_bounds = array<i64: 1, 16, 128>}]} {
    %c0 = arith.constant 0 : index
    %c0_0 = arith.constant 0 : index
    %c0_1 = arith.constant 0 : index
    %0 = vector.load %arg1[%c0, %c0_0, %c0_1] : memref<2x8x448xf32, #tpu.memory_space<vmem>>, vector<1x8x448xf32>
    %1 = vector.shape_cast %0 : vector<1x8x448xf32> to vector<8x448xf32>
    %2 = vector.extract_strided_slice %1 {offsets = [0, 0], sizes = [8, 384], strides = [1, 1]} : vector<8x448xf32> to vector<8x384xf32>
    %c0_2 = arith.constant 0 : index
    %c0_3 = arith.constant 0 : index
    %3 = vector.load %arg6[%c0_2, %c0_3] : memref<72x768xf32, #tpu.memory_space<vmem>>, vector<8x384xf32>
    tpu.vector_store %arg6[%c0_2, %c0_3], %2 {strides = array<i32>} : memref<72x768xf32, #tpu.memory_space<vmem>>, vector<8x384xf32>,
    %4 = vector.extract_strided_slice %1 {offsets = [0, 1], sizes = [8, 384], strides = [1, 1]} : vector<8x448xf32> to vector<8x384xf32>
    %c8 = arith.constant 8 : index
    %c0_4 = arith.constant 0 : index
    %5 = vector.load %arg6[%c8, %c0_4] : memref<72x768xf32, #tpu.memory_space<vmem>>, vector<8x384xf32>
    tpu.vector_store %arg6[%c8, %c0_4], %4 {strides = array<i32>} : memref<72x768xf32, #tpu.memory_space<vmem>>, vector<8x384xf32>,
    %6 = vector.extract_strided_slice %1 {offsets = [0, 2], sizes = [8, 384], strides = [1, 1]} : vector<8x448xf32> to vector<8x384xf32>
    %c16 = arith.constant 16 : index
    %c0_5 = arith.constant 0 : index
    %7 = vector.load %arg6[%c16, %c0_5] : memref<72x768xf32, #tpu.memory_space<vmem>>, vector<8x384xf32>
    tpu.vector_store %arg6[%c16, %c0_5], %6 {strides = array<i32>} : memref<72x768xf32, #tpu.memory_space<vmem>>, vector<8x384xf32>,
    %8 = vector.extract_strided_slice %1 {offsets = [0, 18], sizes = [8, 384], strides = [1, 1]} : vector<8x448xf32> to vector<8x384xf32>
    %c24 = arith.constant 24 : index
    %c0_6 = arith.constant 0 : index
    %9 = vector.load %arg6[%c24, %c0_6] : memref<72x768xf32, #tpu.memory_space<vmem>>, vector<8x384xf32>
    tpu.vector_store %arg6[%c24, %c0_6], %8 {strides = array<i32>} : memref<72x768xf32, #tpu.memory_space<vmem>>, vector<8x384xf32>,
    %10 = vector.extract_strided_slice %1 {offsets = [0, 19], sizes = [8, 384], strides = [1, 1]} : vector<8x448xf32> to vector<8x384xf32>
    %c32 = arith.constant 32 : index
    %c0_7 = arith.constant 0 : index
    %11 = vector.load %arg6[%c32, %c0_7] : memref<72x768xf32, #tpu.memory_space<vmem>>, vector<8x384xf32>
    tpu.vector_store %arg6[%c32, %c0_7], %10 {strides = array<i32>} : memref<72x768xf32, #tpu.memory_space<vmem>>, vector<8x384xf32>,
    %12 = vector.extract_strided_slice %1 {offsets = [0, 20], sizes = [8, 384], strides = [1, 1]} : vector<8x448xf32> to vector<8x384xf32>
    %c40 = arith.constant 40 : index
    %c0_8 = arith.constant 0 : index
    %13 = vector.load %arg6[%c40, %c0_8] : memref<72x768xf32, #tpu.memory_space<vmem>>, vector<8x384xf32>
    tpu.vector_store %arg6[%c40, %c0_8], %12 {strides = array<i32>} : memref<72x768xf32, #tpu.memory_space<vmem>>, vector<8x384xf32>,
    %14 = vector.extract_strided_slice %1 {offsets = [0, 36], sizes = [8, 384], strides = [1, 1]} : vector<8x448xf32> to vector<8x384xf32>
    %c48 = arith.constant 48 : index
    %c0_9 = arith.constant 0 : index
    %15 = vector.load %arg6[%c48, %c0_9] : memref<72x768xf32, #tpu.memory_space<vmem>>, vector<8x384xf32>
    tpu.vector_store %arg6[%c48, %c0_9], %14 {strides = array<i32>} : memref<72x768xf32, #tpu.memory_space<vmem>>, vector<8x384xf32>,
    %16 = vector.extract_strided_slice %1 {offsets = [0, 37], sizes = [8, 384], strides = [1, 1]} : vector<8x448xf32> to vector<8x384xf32>
    %c56 = arith.constant 56 : index
    %c0_10 = arith.constant 0 : index
    %17 = vector.load %arg6[%c56, %c0_10] : memref<72x768xf32, #tpu.memory_space<vmem>>, vector<8x384xf32>
    tpu.vector_store %arg6[%c56, %c0_10], %16 {strides = array<i32>} : memref<72x768xf32, #tpu.memory_space<vmem>>, vector<8x384xf32>,
    %18 = vector.extract_strided_slice %1 {offsets = [0, 38], sizes = [8, 384], strides = [1, 1]} : vector<8x448xf32> to vector<8x384xf32>
    %c64 = arith.constant 64 : index
    %c0_11 = arith.constant 0 : index
    %19 = vector.load %arg6[%c64, %c0_11] : memref<72x768xf32, #tpu.memory_space<vmem>>, vector<8x384xf32>
    tpu.vector_store %arg6[%c64, %c0_11], %18 {strides = array<i32>} : memref<72x768xf32, #tpu.memory_space<vmem>>, vector<8x384xf32>,
    %c1 = arith.constant 1 : index
    %c0_12 = arith.constant 0 : index
    %c0_13 = arith.constant 0 : index
    %20 = vector.load %arg1[%c1, %c0_12, %c0_13] : memref<2x8x448xf32, #tpu.memory_space<vmem>>, vector<1x8x448xf32>
    %21 = vector.shape_cast %20 : vector<1x8x448xf32> to vector<8x448xf32>
    %22 = vector.extract_strided_slice %21 {offsets = [0, 0], sizes = [8, 384], strides = [1, 1]} : vector<8x448xf32> to vector<8x384xf32>
    %c0_14 = arith.constant 0 : index
    %c384 = arith.constant 384 : index
    %23 = vector.load %arg6[%c0_14, %c384] : memref<72x768xf32, #tpu.memory_space<vmem>>, vector<8x384xf32>
    tpu.vector_store %arg6[%c0_14, %c384], %22 {strides = array<i32>} : memref<72x768xf32, #tpu.memory_space<vmem>>, vector<8x384xf32>,
    %24 = vector.extract_strided_slice %21 {offsets = [0, 1], sizes = [8, 384], strides = [1, 1]} : vector<8x448xf32> to vector<8x384xf32>
    %c8_15 = arith.constant 8 : index
    %c384_16 = arith.constant 384 : index
    %25 = vector.load %arg6[%c8_15, %c384_16] : memref<72x768xf32, #tpu.memory_space<vmem>>, vector<8x384xf32>
    tpu.vector_store %arg6[%c8_15, %c384_16], %24 {strides = array<i32>} : memref<72x768xf32, #tpu.memory_space<vmem>>, vector<8x384xf32>,
    %26 = vector.extract_strided_slice %21 {offsets = [0, 2], sizes = [8, 384], strides = [1, 1]} : vector<8x448xf32> to vector<8x384xf32>
    %c16_17 = arith.constant 16 : index
    %c384_18 = arith.constant 384 : index
    %27 = vector.load %arg6[%c16_17, %c384_18] : memref<72x768xf32, #tpu.memory_space<vmem>>, vector<8x384xf32>
    tpu.vector_store %arg6[%c16_17, %c384_18], %26 {strides = array<i32>} : memref<72x768xf32, #tpu.memory_space<vmem>>, vector<8x384xf32>,
    %28 = vector.extract_strided_slice %21 {offsets = [0, 18], sizes = [8, 384], strides = [1, 1]} : vector<8x448xf32> to vector<8x384xf32>
    %c24_19 = arith.constant 24 : index
    %c384_20 = arith.constant 384 : index
    %29 = vector.load %arg6[%c24_19, %c384_20] : memref<72x768xf32, #tpu.memory_space<vmem>>, vector<8x384xf32>
    tpu.vector_store %arg6[%c24_19, %c384_20], %28 {strides = array<i32>} : memref<72x768xf32, #tpu.memory_space<vmem>>, vector<8x384xf32>,
    %30 = vector.extract_strided_slice %21 {offsets = [0, 19], sizes = [8, 384], strides = [1, 1]} : vector<8x448xf32> to vector<8x384xf32>
    %c32_21 = arith.constant 32 : index
    %c384_22 = arith.constant 384 : index
    %31 = vector.load %arg6[%c32_21, %c384_22] : memref<72x768xf32, #tpu.memory_space<vmem>>, vector<8x384xf32>
    tpu.vector_store %arg6[%c32_21, %c384_22], %30 {strides = array<i32>} : memref<72x768xf32, #tpu.memory_space<vmem>>, vector<8x384xf32>,
    %32 = vector.extract_strided_slice %21 {offsets = [0, 20], sizes = [8, 384], strides = [1, 1]} : vector<8x448xf32> to vector<8x384xf32>
    %c40_23 = arith.constant 40 : index
    %c384_24 = arith.constant 384 : index
    %33 = vector.load %arg6[%c40_23, %c384_24] : memref<72x768xf32, #tpu.memory_space<vmem>>, vector<8x384xf32>
    tpu.vector_store %arg6[%c40_23, %c384_24], %32 {strides = array<i32>} : memref<72x768xf32, #tpu.memory_space<vmem>>, vector<8x384xf32>,
    %34 = vector.extract_strided_slice %21 {offsets = [0, 36], sizes = [8, 384], strides = [1, 1]} : vector<8x448xf32> to vector<8x384xf32>
    %c48_25 = arith.constant 48 : index
    %c384_26 = arith.constant 384 : index
    %35 = vector.load %arg6[%c48_25, %c384_26] : memref<72x768xf32, #tpu.memory_space<vmem>>, vector<8x384xf32>
    tpu.vector_store %arg6[%c48_25, %c384_26], %34 {strides = array<i32>} : memref<72x768xf32, #tpu.memory_space<vmem>>, vector<8x384xf32>,
    %36 = vector.extract_strided_slice %21 {offsets = [0, 37], sizes = [8, 384], strides = [1, 1]} : vector<8x448xf32> to vector<8x384xf32>
    %c56_27 = arith.constant 56 : index
    %c384_28 = arith.constant 384 : index
    %37 = vector.load %arg6[%c56_27, %c384_28] : memref<72x768xf32, #tpu.memory_space<vmem>>, vector<8x384xf32>
    tpu.vector_store %arg6[%c56_27, %c384_28], %36 {strides = array<i32>} : memref<72x768xf32, #tpu.memory_space<vmem>>, vector<8x384xf32>,
    %38 = vector.extract_strided_slice %21 {offsets = [0, 38], sizes = [8, 384], strides = [1, 1]} : vector<8x448xf32> to vector<8x384xf32>
    %c64_29 = arith.constant 64 : index
    %c384_30 = arith.constant 384 : index
    %39 = vector.load %arg6[%c64_29, %c384_30] : memref<72x768xf32, #tpu.memory_space<vmem>>, vector<8x384xf32>
    tpu.vector_store %arg6[%c64_29, %c384_30], %38 {strides = array<i32>} : memref<72x768xf32, #tpu.memory_space<vmem>>, vector<8x384xf32>,
    %c0_31 = arith.constant 0 : index
    %c0_32 = arith.constant 0 : index
    %40 = vector.load %arg2[%c0_31, %c0_32] : memref<16x72xf32, #tpu.memory_space<vmem>>, vector<16x72xf32>
    %c0_33 = arith.constant 0 : index
    %c0_34 = arith.constant 0 : index
    %41 = vector.load %arg6[%c0_33, %c0_34] : memref<72x768xf32, #tpu.memory_space<vmem>>, vector<72x768xf32>
    %cst = arith.constant dense<0.000000e+00> : vector<16x768xf32>
    %42 = tpu.matmul %40, %41, %cst {dimension_numbers = #tpu.dot_dimension_numbers<[1], [0], [0], [1], [0, 0, 1, 1], [], []>} : vector<16x72xf32>, vector<72x768xf32>, vector<16x768xf32> -> vector<16x768xf32>
    %c0_35 = arith.constant 0 : index
    %c0_36 = arith.constant 0 : index
    %43 = vector.load %arg3[%c0_35, %c0_36] : memref<16x1xf32, #tpu.memory_space<vmem>>, vector<16x1xf32>
    %44 = vector.broadcast %43 : vector<16x1xf32> to vector<16x768xf32>
    %45 = arith.addf %42, %44 : vector<16x768xf32>
    %cst_37 = arith.constant 0.000000e+00 : f32
    %46 = vector.broadcast %cst_37 : f32 to vector<16x768xf32>
    %47 = arith.maximumf %45, %46 : vector<16x768xf32>
    %48 = vector.extract_strided_slice %47 {offsets = [0, 0], sizes = [16, 767], strides = [1, 1]} : vector<16x768xf32> to vector<16x767xf32>
    %49 = vector.extract_strided_slice %47 {offsets = [0, 1], sizes = [16, 767], strides = [1, 1]} : vector<16x768xf32> to vector<16x767xf32>
    %50 = arith.maximumf %48, %49 : vector<16x767xf32>
    %51 = vector.extract_strided_slice %50 {offsets = [0, 0], sizes = [16, 749], strides = [1, 1]} : vector<16x767xf32> to vector<16x749xf32>
    %52 = vector.extract_strided_slice %50 {offsets = [0, 18], sizes = [16, 749], strides = [1, 1]} : vector<16x767xf32> to vector<16x749xf32>
    %53 = arith.maximumf %51, %52 : vector<16x749xf32>
    %c0_38 = arith.constant 0 : index
    %c0_39 = arith.constant 0 : index
    %54 = vector.load %arg4[%c0_38, %c0_39] : memref<749x128xf32, #tpu.memory_space<vmem>>, vector<749x128xf32>
    %cst_40 = arith.constant dense<0.000000e+00> : vector<16x128xf32>
    %55 = tpu.matmul %53, %54, %cst_40 {dimension_numbers = #tpu.dot_dimension_numbers<[1], [0], [0], [1], [0, 0, 1, 1], [], []>} : vector<16x749xf32>, vector<749x128xf32>, vector<16x128xf32> -> vector<16x128xf32>
    %c0_41 = arith.constant 0 : index
    %c0_42 = arith.constant 0 : index
    %c0_43 = arith.constant 0 : index
    %56 = vector.load %arg5[%c0_41, %c0_42, %c0_43] : memref<1x16x128xf32, #tpu.memory_space<vmem>>, vector<1x16x128xf32>
    %57 = vector.shape_cast %56 : vector<1x16x128xf32> to vector<16x128xf32>
    %58 = vector.shape_cast %55 : vector<16x128xf32> to vector<1x16x128xf32>
    tpu.vector_store %arg5[%c0_41, %c0_42, %c0_43], %58 {strides = array<i32>} : memref<1x16x128xf32, #tpu.memory_space<vmem>>, vector<1x16x128xf32>,
    return
  }
  func.func @transform_0(%arg0: i32) -> (i32, i32, i32) {
    %c0_i32 = arith.constant 0 : i32
    %c0_i32_0 = arith.constant 0 : i32
    %c0_i32_1 = arith.constant 0 : i32
    return %arg0, %c0_i32, %c0_i32_0 : i32, i32, i32
  }
  func.func @transform_1(%arg0: i32) -> (i32, i32) {
    %c0_i32 = arith.constant 0 : i32
    %c0_i32_0 = arith.constant 0 : i32
    %c0_i32_1 = arith.constant 0 : i32
    return %c0_i32, %c0_i32_0 : i32, i32
  }
  func.func @transform_2(%arg0: i32) -> (i32, i32) {
    %c0_i32 = arith.constant 0 : i32
    %c0_i32_0 = arith.constant 0 : i32
    %c0_i32_1 = arith.constant 0 : i32
    return %c0_i32, %c0_i32_0 : i32, i32
  }
  func.func @transform_3(%arg0: i32) -> (i32, i32) {
    %c0_i32 = arith.constant 0 : i32
    %c0_i32_0 = arith.constant 0 : i32
    %c0_i32_1 = arith.constant 0 : i32
    return %c0_i32, %c0_i32_0 : i32, i32
  }
  func.func @transform_4(%arg0: i32) -> (i32, i32, i32) {
    %c0_i32 = arith.constant 0 : i32
    %c0_i32_0 = arith.constant 0 : i32
    %c0_i32_1 = arith.constant 0 : i32
    return %arg0, %c0_i32, %c0_i32_0 : i32, i32, i32
  }
}

</mosaic_0001>

<bundles_post_ra>
// kernel: tpu_custom_call.1
= control target key start
LH: loop header
LB: loop body
LE: loop exit
PB: predicated region body
PF: predicated region fallthrough
CT: control target
= control target key end

     0   :  { %9 = vsyncpa [#allocation4], 0  ;;  %s1769_s0 = inlined_call_operand.hbm [shape: f32[2,8,448], index: 0, kind: input, shape index: {}]   ;;  %s1770_s1 = inlined_call_operand.vmem [shape: f32[16,72], index: 1, kind: input, shape index: {}]   ;;  %s1771_s2 = inlined_call_operand.vmem [shape: f32[16,1], index: 2, kind: input, shape index: {}]   ;;  %s1772_s3 = inlined_call_operand.hbm [shape: f32[749,128], index: 3, kind: input, shape index: {}]   ;;  %s1773_s4 = inlined_call_operand.hbm [shape: f32[1,16,128], index: 4, kind: output, shape index: {}]  }
   0x1   :  { %10 = vsyncpa [#allocation7], 0 }
   0x2   :  { %11 = vsyncpa [#allocation5], 0  ;;  %s16_s17 = sshll.u32 %s1769_s0, 4  ;;  %s1298_s18 = smov [#allocation3]   ;;  %s17_s17 = int_to_ptr.hbm [resolvable:$true] %s16_s17 }
   0x3   :  { %s18_s19 = sshll.u32 %s1298_s18, 4  ;;  %s33_s22 = sshll.u32 %s1772_s3, 4  ;;  %s19_s19 = int_to_ptr.vmem [resolvable:$true] %s18_s19  ;;  %s34_s22 = int_to_ptr.hbm [resolvable:$true] %s33_s22 }
   0x4   :  { %s1299_s23 = smov 512   ;;  %s1300_s24 = smov 32  }
   0x5   :  { %24 = dma.hbm_to_vmem [thread:$0]  %s17_s17, 1024, %s19_s19, [#allocation4], %s1299_s23, %s1299_s23, %s1300_s24  }
   0x6   :  { %s1301_s25 = smov [#allocation6]   ;;  %s1302_s27 = smov 128  }
   0x7   :  { %s35_s26 = sshll.u32 %s1301_s25, 4  ;;  %s1303_s28 = smov 8   ;;  %s36_s26 = int_to_ptr.vmem [resolvable:$true] %s35_s26 }
   0x8   :  { %41 = dma.hbm_to_vmem [thread:$0]  %s34_s22, 12032, %s36_s26, [#allocation7], %s1302_s27, %s1302_s27, %s1303_s28  }
   0x9   :  { %1292 = dma.done.wait [#allocation4], 1024  }
   0xa   :  { %1293 = vsyncadd [#allocation4], 4294966272 }
   0xb   :  { %1294 = dma.done.wait [#allocation7], 12032  }
   0xc   :  { %1295 = vsyncadd [#allocation7], 4294955264  ;;  %v1348_v0 = vld [vmem:[#allocation3 + $0x20] sm:$0xff]  ;;  %v1350_v1 = vld [vmem:[#allocation3 + $0x28] sm:$0xff]  ;;  %s1304_s0 = smov 91   ;;  %s1305_s3 = smov 90  }
   0xd   :  { %v1352_v2 = vld [vmem:[#allocation3 + $0x10] sm:$0xff]  ;;  %v1033_v3 = vpack.i.bf16 %v1350_v1, %v1348_v0  ;;  %v53_v4 = vld [vmem:[#allocation3 + $0x18] sm:$0xff]  ;;  %s1306_s29 = smov 108   ;;  %s1307_s30 = smov 92   ;;  %v1363_v6 = vld [vmem:[#allocation3] sm:$0xff]  ;;  %vm177_vm0 = vcmask 744448  }
   0xe   :  { %v1013_v5 = vpack.i.bf16 %v53_v4, %v1352_v2  ;;  %v1365_v7 = vld [vmem:[#allocation3 + $0x8] sm:$0xff]  ;;  %s1308_s5 = smov 109   ;;  %s1309_s6 = smov 110   ;;  %v1381_v9 = vld [vmem:[#allocation3 + $0x30] sm:$0xff]  ;;  %v209_v10 = vld [vmem:[#allocation3 + $0x38] sm:$0xff]  ;;  %vm195_vm1 = vcmask 736256  }
   0xf   :  { %1034 = vrot.lane.b32.xlu2 %v1033_v3, %s1304_s0  ;;  %1024 = vrot.lane.b32.xlu1 %v1033_v3, %s1305_s3  ;;  %v1043_v8 = vpack.i.bf16 %v1365_v7, %v1363_v6  ;;  %s1310_s7 = smov 126   ;;  %s1311_s8 = smov 127   ;;  %v1138_v11 = vpack.i.bf16 %v209_v10, %v1381_v9  ;;  %vm159_vm2 = vcmask 752640   ;;  %vm141_vm3 = vcmask 883712  }
  0x10   :  { %1014 = vrot.lane.b32.xlu0 %v1013_v5, %s1305_s3  ;;  %vm123_vm4 = vcmask 891904   ;;  %vm105_vm5 = vcmask 900096   ;;  %vm87_vm6 = vcmask 1031168   ;;  %vm69_vm7 = vcmask 1039360   ;;  %s968_s19 = sshll.u32 %s1773_s4, 4  ;;  %s969_s19 = int_to_ptr.hbm [resolvable:$true] %s968_s19 }
  0x11   :  { %vm421_vm8 = vcmask 588800   ;;  %vm818_vm9 = vcmask 1044480  }
  0x17   :  { %1039 = vrot.lane.b32.xlu2 %v1013_v5, %s1306_s29  ;;  %1029 = vrot.lane.b32.xlu1 %v1013_v5, %s1307_s30 }
  0x18   :  { %1019 = vrot.lane.b32.xlu0 %v1013_v5, %s1304_s0 }
  0x1f   :  { %1054 = vrot.lane.b32.xlu2 %v1013_v5, %s1308_s5  ;;  %1049 = vrot.lane.b32.xlu1 %v1033_v3, %s1307_s30 }
  0x20   :  { %1044 = vrot.lane.b32.xlu0 %v1043_v8, %s1305_s3 }
  0x27   :  { %1069 = vrot.lane.b32.xlu2 %v1013_v5, %s1309_s6  ;;  %1064 = vrot.lane.b32.xlu1 %v1033_v3, %s1306_s29 }
  0x28   :  { %1059 = vrot.lane.b32.xlu0 %v1043_v8, %s1304_s0 }
  0x2f   :  { %1084 = vrot.lane.b32.xlu2 %v1013_v5, %s1310_s7  ;;  %1079 = vrot.lane.b32.xlu1 %v1033_v3, %s1308_s5 }
  0x30   :  { %1074 = vrot.lane.b32.xlu0 %v1043_v8, %s1307_s30 }
  0x37   :  { %1099 = vrot.lane.b32.xlu2 %v1013_v5, %s1311_s8  ;;  %1094 = vrot.lane.b32.xlu1 %v1033_v3, %s1309_s6 }
  0x38   :  { %1089 = vrot.lane.b32.xlu0 %v1043_v8, %s1306_s29 }
  0x3f   :  { %1109 = vrot.lane.b32.xlu1 %v1033_v3, %s1310_s7  ;;  %1114 = vrot.lane.b32.xlu2 %v1043_v8, %s1309_s6 }
  0x40   :  { %1104 = vrot.lane.b32.xlu0 %v1043_v8, %s1308_s5 }
  0x47   :  { %1124 = vrot.lane.b32.xlu1 %v1043_v8, %s1310_s7  ;;  %1129 = vrot.lane.b32.xlu2 %v1043_v8, %s1311_s8 }
  0x48   :  { %1119 = vrot.lane.b32.xlu0 %v1033_v3, %s1311_s8 }
  0x4f   :  { %1139 = vrot.lane.b32.xlu1 %v1138_v11, %s1304_s0  ;;  %1144 = vrot.lane.b32.xlu2 %v1138_v11, %s1307_s30 }
  0x50   :  { %1134 = vrot.lane.b32.xlu0 %v1138_v11, %s1305_s3 }
  0x57   :  { %1154 = vrot.lane.b32.xlu1 %v1138_v11, %s1308_s5  ;;  %1159 = vrot.lane.b32.xlu2 %v1138_v11, %s1309_s6 }
  0x58   :  { %1149 = vrot.lane.b32.xlu0 %v1138_v11, %s1306_s29 }
  0x5f   :  { %1169 = vrot.lane.b32.xlu1 %v1138_v11, %s1311_s8 }
  0x60   :  { %1164 = vrot.lane.b32.xlu0 %v1138_v11, %s1310_s7 }
  0x69   :  { %v1390_v12 = vpop.permute.xlu2 %1034 }
  0x6a   :  { %v1037_v15 = vunpack.i.h.bf16 %v1390_v12  ;;  %v1036_v16 = vunpack.i.l.bf16 %v1390_v12 }
  0x6c   :  { %v327_v25 = vsel %vm177_vm0, %v1036_v16, %v1037_v15  ;;  %v1470_v16 = vld [vmem:[%s1770_s1] sm:$0xff] }
  0x71   :  { %v1392_v13 = vpop.permute.xlu2 %1039 }
  0x72   :  { %v1042_v32 = vunpack.i.h.bf16 %v1392_v13  ;;  %v1041_v33 = vunpack.i.l.bf16 %v1392_v13  ;;  %v410_v13 = vld [vmem:[%s1771_s2 + $0x8] sm:$0xff] }
  0x74   :  { %v144_v40 = vsel %vm141_vm3, %v1041_v33, %v1042_v32 }
  0x79   :  { %v1394_v14 = vpop.permute.xlu2 %1054 }
  0x7a   :  { %v1057_v36 = vunpack.i.h.bf16 %v1394_v14  ;;  %v1056_v37 = vunpack.i.l.bf16 %v1394_v14 }
  0x7c   :  { %v126_v44 = vsel %vm123_vm4, %v1056_v37, %v1057_v36 }
  0x81   :  { %v1398_v17 = vpop.permute.xlu1 %1024  ;;  %v1400_v18 = vpop.permute.xlu2 %1069 }
  0x82   :  { %v1027_v19 = vunpack.i.h.bf16 %v1398_v17  ;;  %v1026_v20 = vunpack.i.l.bf16 %v1398_v17  ;;  %v1015_v21 = vpop.permute.xlu0 %1014  ;;  %v1072_v41 = vunpack.i.h.bf16 %v1400_v18  ;;  %v1071_v42 = vunpack.i.l.bf16 %v1400_v18 }
  0x83   :  { %v1017_v22 = vunpack.i.h.bf16 %v1015_v21  ;;  %v1016_v23 = vunpack.i.l.bf16 %v1015_v21 }
  0x84   :  { %v344_v24 = vsel %vm195_vm1, %v1026_v20, %v1027_v19  ;;  %v108_v56 = vsel %vm105_vm5, %v1071_v42, %v1072_v41 }
  0x85   :  { %v198_v26 = vsel %vm195_vm1, %v1016_v23, %v1017_v22  ;;  %504 = vmatpush.msra.mxu3 %v344_v24 }
  0x86   :  { %481 = vmatpush.msra.mxu2 %v198_v26 }
  0x87   :  { %505 = vmatpush.msra.mxu3 %v327_v25 }
  0x89   :  { %v1411_v27 = vpop.permute.xlu2 %1084  ;;  %v1413_v28 = vpop.permute.xlu1 %1029 }
  0x8a   :  { %v1032_v29 = vunpack.i.h.bf16 %v1413_v28  ;;  %v1031_v30 = vunpack.i.l.bf16 %v1413_v28  ;;  %v1020_v31 = vpop.permute.xlu0 %1019  ;;  %v1087_v45 = vunpack.i.h.bf16 %v1411_v27  ;;  %v1086_v46 = vunpack.i.l.bf16 %v1411_v27 }
  0x8b   :  { %v1022_v34 = vunpack.i.h.bf16 %v1020_v31  ;;  %v1021_v35 = vunpack.i.l.bf16 %v1020_v31  ;;  %v1488_v31 = vld [vmem:[%s1770_s1 + $0x8] sm:$0xff] }
  0x8c   :  { %v162_v39 = vsel %vm159_vm2, %v1031_v30, %v1032_v29  ;;  %v90_v59 = vsel %vm87_vm6, %v1086_v46, %v1087_v45 }
  0x8d   :  { %v180_v38 = vsel %vm177_vm0, %v1021_v35, %v1022_v34 }
  0x8e   :  { %482 = vmatpush.msra.mxu2 %v180_v38 }
  0x90   :  { %483 = vmatpush.msra.mxu2 %v162_v39 }
  0x91   :  { %v1430_v43 = vpop.permute.xlu1 %1049  ;;  %v1439_v50 = vpop.permute.xlu2 %1099 }
  0x92   :  { %v1052_v47 = vunpack.i.h.bf16 %v1430_v43  ;;  %v1051_v48 = vunpack.i.l.bf16 %v1430_v43  ;;  %v1045_v49 = vpop.permute.xlu0 %1044  ;;  %484 = vmatpush.msra.mxu2 %v144_v40  ;;  %v1102_v53 = vunpack.i.h.bf16 %v1439_v50  ;;  %v1101_v54 = vunpack.i.l.bf16 %v1439_v50 }
  0x93   :  { %v1047_v51 = vunpack.i.h.bf16 %v1045_v49  ;;  %v1046_v52 = vunpack.i.l.bf16 %v1045_v49 }
  0x94   :  { %v310_v55 = vsel %vm159_vm2, %v1051_v48, %v1052_v47  ;;  %485 = vmatpush.msra.mxu2 %v126_v44  ;;  %v72_v60 = vsel %vm69_vm7, %v1101_v54, %v1102_v53 }
  0x95   :  { %v196_v57 = vsel %vm195_vm1, %v1046_v52, %v1047_v51  ;;  %v197_v58 = vsel %vm195_vm1, %v1047_v51, %v1016_v23  ;;  %506 = vmatpush.msra.mxu3 %v310_v55 }
  0x96   :  { %435 = vmatpush.msra.mxu0 %v196_v57  ;;  %458 = vmatpush.msra.mxu1 %v197_v58 }
  0x97   :  { %486 = vmatpush.msra.mxu2 %v108_v56  ;;  %v1312_v56 = vmov 0  }
  0x98   :  { %1174 = vset.pattern.permute.xlu0 %v1312_v56  ;;  %1173 = vset.pattern.permute.xlu2 %v1312_v56 }
  0x99   :  { %v1457_v61 = vpop.permute.xlu1 %1064  ;;  %487 = vmatpush.msra.mxu2 %v90_v59  ;;  %v1115_v38 = vpop.permute.xlu2 %1114  ;;  %418 = vperm.xlu0 %1174, %v410_v13  }
  0x9a   :  { %v1067_v62 = vunpack.i.h.bf16 %v1457_v61  ;;  %v1066_v63 = vunpack.i.l.bf16 %v1457_v61  ;;  %v1060_v3 = vpop.permute.xlu0 %1059  ;;  %v1116_v44 = vunpack.i.l.bf16 %v1115_v38  ;;  %v1117_v52 = vunpack.i.h.bf16 %v1115_v38 }
  0x9b   :  { %v1062_v4 = vunpack.i.h.bf16 %v1060_v3  ;;  %v1061_v5 = vunpack.i.l.bf16 %v1060_v3  ;;  %488 = vmatpush.msra.mxu2 %v72_v60 }
  0x9c   :  { %v293_v8 = vsel %vm141_vm3, %v1066_v63, %v1067_v62  ;;  %v106_v59 = vsel %vm105_vm5, %v1116_v44, %v1117_v52  ;;  %v107_v63 = vsel %vm105_vm5, %v1117_v52, %v1071_v42 }
  0x9d   :  { %v178_v10 = vsel %vm177_vm0, %v1061_v5, %v1062_v4  ;;  %v179_v11 = vsel %vm177_vm0, %v1062_v4, %v1021_v35  ;;  %507 = vmatpush.msra.mxu3 %v293_v8  ;;  %489 = vmatpush.msra.mxu2 %v1352_v2 }
  0x9e   :  { %436 = vmatpush.msra.mxu0 %v178_v10  ;;  %459 = vmatpush.msra.mxu1 %v179_v11 }
  0x9f   :  { %986 = vmatmul.msk.f32.vlgmr.msra.gmra.mxu2 %vm421_vm8, %v1470_v16 }
  0xa1   :  { %v1472_v20 = vpop.permute.xlu1 %1079  ;;  %v1130_v60 = vpop.permute.xlu2 %1129 }
  0xa2   :  { %v1082_v21 = vunpack.i.h.bf16 %v1472_v20  ;;  %v1081_v22 = vunpack.i.l.bf16 %v1472_v20  ;;  %v1075_v23 = vpop.permute.xlu0 %1074  ;;  %v1131_v3 = vunpack.i.l.bf16 %v1130_v60  ;;  %v1132_v5 = vunpack.i.h.bf16 %v1130_v60 }
  0xa3   :  { %v1077_v24 = vunpack.i.h.bf16 %v1075_v23  ;;  %v1076_v2 = vunpack.i.l.bf16 %v1075_v23 }
  0xa4   :  { %v276_v25 = vsel %vm123_vm4, %v1081_v22, %v1082_v21  ;;  %v70_v42 = vsel %vm69_vm7, %v1131_v3, %v1132_v5 }
  0xa5   :  { %v160_v26 = vsel %vm159_vm2, %v1076_v2, %v1077_v24  ;;  %v161_v29 = vsel %vm159_vm2, %v1077_v24, %v1031_v30  ;;  %508 = vmatpush.msra.mxu3 %v276_v25  ;;  %v71_v24 = vsel %vm69_vm7, %v1132_v5, %v1101_v54 }
  0xa6   :  { %437 = vmatpush.msra.mxu0 %v160_v26  ;;  %460 = vmatpush.msra.mxu1 %v161_v29 }
  0xa7   :  { %987 = vmatmul.msk.f32.gmra.mxu2 %vm421_vm8, %v1488_v31 }
  0xa9   :  { %v1490_v32 = vpop.permute.xlu1 %1094  ;;  %v1145_v2 = vpop.permute.xlu2 %1144 }
  0xaa   :  { %v1097_v34 = vunpack.i.h.bf16 %v1490_v32  ;;  %v1096_v35 = vunpack.i.l.bf16 %v1490_v32  ;;  %v1090_v28 = vpop.permute.xlu0 %1089  ;;  %v1147_v50 = vunpack.i.h.bf16 %v1145_v2 }
  0xab   :  { %v1092_v36 = vunpack.i.h.bf16 %v1090_v28  ;;  %v1091_v30 = vunpack.i.l.bf16 %v1090_v28 }
  0xac   :  { %v259_v39 = vsel %vm105_vm5, %v1096_v35, %v1097_v34 }
  0xad   :  { %v142_v40 = vsel %vm141_vm3, %v1091_v30, %v1092_v36  ;;  %v143_v41 = vsel %vm141_vm3, %v1092_v36, %v1041_v33  ;;  %509 = vmatpush.msra.mxu3 %v259_v39 }
  0xae   :  { %438 = vmatpush.msra.mxu0 %v142_v40  ;;  %461 = vmatpush.msra.mxu1 %v143_v41 }
  0xb1   :  { %v1503_v45 = vpop.permute.xlu1 %1109  ;;  %v1160_v38 = vpop.permute.xlu2 %1159 }
  0xb2   :  { %v1112_v48 = vunpack.i.h.bf16 %v1503_v45  ;;  %v1111_v49 = vunpack.i.l.bf16 %v1503_v45  ;;  %v1105_v51 = vpop.permute.xlu0 %1104  ;;  %v1162_v12 = vunpack.i.h.bf16 %v1160_v38 }
  0xb3   :  { %v1107_v53 = vunpack.i.h.bf16 %v1105_v51  ;;  %v1106_v55 = vunpack.i.l.bf16 %v1105_v51 }
  0xb4   :  { %v242_v33 = vsel %vm87_vm6, %v1111_v49, %v1112_v48  ;;  %v1161_v49 = vunpack.i.l.bf16 %v1160_v38 }
  0xb5   :  { %v124_v57 = vsel %vm123_vm4, %v1106_v55, %v1107_v53  ;;  %v125_v58 = vsel %vm123_vm4, %v1107_v53, %v1056_v37  ;;  %510 = vmatpush.msra.mxu3 %v242_v33 }
  0xb6   :  { %439 = vmatpush.msra.mxu0 %v124_v57  ;;  %462 = vmatpush.msra.mxu1 %v125_v58  ;;  %v261_v53 = vsel %vm105_vm5, %v1161_v49, %v1162_v12  ;;  %v260_v61 = vsel %vm105_vm5, %v1097_v34, %v1161_v49 }
  0xb8   :  { %463 = vmatpush.msra.mxu1 %v107_v63  ;;  %440 = vmatpush.msra.mxu0 %v106_v59 }
  0xb9   :  { %v1125_v4 = vpop.permute.xlu1 %1124 }
  0xba   :  { %v1127_v8 = vunpack.i.h.bf16 %v1125_v4  ;;  %v1126_v14 = vunpack.i.l.bf16 %v1125_v4  ;;  %v1521_v10 = vpop.permute.xlu0 %1119 }
  0xbb   :  { %v1122_v37 = vunpack.i.h.bf16 %v1521_v10  ;;  %v1121_v11 = vunpack.i.l.bf16 %v1521_v10 }
  0xbc   :  { %v88_v22 = vsel %vm87_vm6, %v1126_v14, %v1127_v8  ;;  %v89_v18 = vsel %vm87_vm6, %v1127_v8, %v1086_v46 }
  0xbd   :  { %441 = vmatpush.msra.mxu0 %v88_v22  ;;  %464 = vmatpush.msra.mxu1 %v89_v18  ;;  %v225_v23 = vsel %vm69_vm7, %v1121_v11, %v1122_v37 }
  0xbe   :  { %511 = vmatpush.msra.mxu3 %v225_v23 }
  0xbf   :  { %442 = vmatpush.msra.mxu0 %v70_v42  ;;  %465 = vmatpush.msra.mxu1 %v71_v24 }
  0xc0   :  { %512 = vmatpush.msra.mxu3 %v1348_v0  ;;  %v409_v0 = vld [vmem:[%s1771_s2] sm:$0xff]  ;;  %s1313_s2 = smov [#allocation8]  }
  0xc1   :  { %988 = vmatmul.msk.f32.vlgmr.msra.gmra.mxu3 %vm421_vm8, %v1470_v16  ;;  %v1140_v27 = vpop.permute.xlu1 %1139  ;;  %443 = vmatpush.msra.mxu0 %v1363_v6  ;;  %v1146_v6 = vunpack.i.l.bf16 %v1145_v2  ;;  %s966_s16 = sshll.u32 %s1313_s2, 4  ;;  %s967_s16 = int_to_ptr.vmem [resolvable:$true] %s966_s16 }
  0xc2   :  { %v1142_v46 = vunpack.i.h.bf16 %v1140_v27  ;;  %v1135_v25 = vpop.permute.xlu0 %1134  ;;  %466 = vmatpush.msra.mxu1 %v1365_v7  ;;  %982 = vmatmul.msk.f32.vlgmr.msra.gmra.mxu0 %vm421_vm8, %v1470_v16  ;;  %v1141_v54 = vunpack.i.l.bf16 %v1140_v27 }
  0xc3   :  { %v1137_v26 = vunpack.i.h.bf16 %v1135_v25  ;;  %v1136_v29 = vunpack.i.l.bf16 %v1135_v25  ;;  %984 = vmatmul.msk.f32.vlgmr.msra.gmra.mxu1 %vm421_vm8, %v1470_v16  ;;  %413 = vperm.xlu2 %1173, %v409_v0   ;;  %v312_v30 = vsel %vm159_vm2, %v1146_v6, %v1147_v50 }
  0xc4   :  { %v329_v28 = vsel %vm177_vm0, %v1141_v54, %v1142_v46  ;;  %v328_v36 = vsel %vm177_vm0, %v1037_v15, %v1141_v54 }
  0xc5   :  { %v345_v7 = vsel %vm195_vm1, %v1027_v19, %v1136_v29  ;;  %v346_v35 = vsel %vm195_vm1, %v1136_v29, %v1137_v26  ;;  %v311_v19 = vsel %vm159_vm2, %v1052_v47, %v1146_v6 }
  0xc6   :  { %527 = vmatpush.msrb.mxu0 %v345_v7  ;;  %550 = vmatpush.msrb.mxu1 %v346_v35 }
  0xc8   :  { %528 = vmatpush.msrb.mxu0 %v328_v36  ;;  %551 = vmatpush.msrb.mxu1 %v329_v28 }
  0xc9   :  { %989 = vmatmul.msk.f32.gmra.mxu3 %vm421_vm8, %v1488_v31  ;;  %v1155_v17 = vpop.permute.xlu1 %1154 }
  0xca   :  { %v1157_v39 = vunpack.i.h.bf16 %v1155_v17  ;;  %v1150_v40 = vpop.permute.xlu0 %1149  ;;  %529 = vmatpush.msrb.mxu0 %v311_v19  ;;  %552 = vmatpush.msrb.mxu1 %v312_v30  ;;  %v1156_v41 = vunpack.i.l.bf16 %v1155_v17 }
  0xcb   :  { %v1152_v15 = vunpack.i.h.bf16 %v1150_v40  ;;  %v1151_v44 = vunpack.i.l.bf16 %v1150_v40  ;;  %983 = vmatmul.msk.f32.gmra.mxu0 %vm421_vm8, %v1488_v31  ;;  %985 = vmatmul.msk.f32.gmra.mxu1 %vm421_vm8, %v1488_v31 }
  0xcc   :  { %v278_v51 = vsel %vm123_vm4, %v1156_v41, %v1157_v39  ;;  %v277_v52 = vsel %vm123_vm4, %v1082_v21, %v1156_v41 }
  0xcd   :  { %v294_v43 = vsel %vm141_vm3, %v1067_v62, %v1151_v44  ;;  %v295_v47 = vsel %vm141_vm3, %v1151_v44, %v1152_v15 }
  0xce   :  { %530 = vmatpush.msrb.mxu0 %v294_v43  ;;  %553 = vmatpush.msrb.mxu1 %v295_v47 }
  0xd0   :  { %531 = vmatpush.msrb.mxu0 %v277_v52  ;;  %554 = vmatpush.msrb.mxu1 %v278_v51 }
  0xd1   :  { %v1170_v55 = vpop.permute.xlu1 %1169 }
  0xd2   :  { %v1172_v62 = vunpack.i.h.bf16 %v1170_v55  ;;  %v1165_v13 = vpop.permute.xlu0 %1164  ;;  %532 = vmatpush.msrb.mxu0 %v260_v61  ;;  %555 = vmatpush.msrb.mxu1 %v261_v53  ;;  %v1171_v33 = vunpack.i.l.bf16 %v1170_v55  ;;  %v733_v53 = vld [vmem:[#allocation6 + $0x78] sm:$0xff]  ;;  %v732_v61 = vld [vmem:[#allocation6 + $0x70] sm:$0xff] }
  0xd3   :  { %v1167_v56 = vunpack.i.h.bf16 %v1165_v13  ;;  %v1166_v57 = vunpack.i.l.bf16 %v1165_v13  ;;  %v749_v55 = vld [vmem:[#allocation6 + $0xf8] sm:$0xff]  ;;  %822 = vmatpush.msrb.mxu2 %v733_v53  ;;  %v736_v53 = vld [vmem:[#allocation6 + $0x90] sm:$0xff] }
  0xd4   :  { %v227_v58 = vsel %vm69_vm7, %v1171_v33, %v1172_v62  ;;  %v226_v32 = vsel %vm69_vm7, %v1122_v37, %v1171_v33  ;;  %845 = vmatpush.msrb.mxu3 %v749_v55  ;;  %v718_v55 = vld [vmem:[#allocation6] sm:$0xff] }
  0xd5   :  { %v243_v20 = vsel %vm87_vm6, %v1112_v48, %v1166_v57  ;;  %v244_v21 = vsel %vm87_vm6, %v1166_v57, %v1167_v56  ;;  %v748_v56 = vld [vmem:[#allocation6 + $0xf0] sm:$0xff]  ;;  %823 = vmatpush.msrb.mxu2 %v732_v61  ;;  %v734_v61 = vld [vmem:[#allocation6 + $0x80] sm:$0xff] }
  0xd6   :  { %533 = vmatpush.msrb.mxu0 %v243_v20  ;;  %556 = vmatpush.msrb.mxu1 %v244_v21  ;;  %v731_v20 = vld [vmem:[#allocation6 + $0x68] sm:$0xff] }
  0xd7   :  { %v747_v21 = vld [vmem:[#allocation6 + $0xe8] sm:$0xff]  ;;  %846 = vmatpush.msrb.mxu3 %v748_v56  ;;  %824 = vmatpush.msrb.mxu2 %v731_v20  ;;  %v780_v20 = vld [vmem:[#allocation6 + $0x1f0] sm:$0xff] }
  0xd8   :  { %534 = vmatpush.msrb.mxu0 %v226_v32  ;;  %557 = vmatpush.msrb.mxu1 %v227_v58  ;;  %v730_v32 = vld [vmem:[#allocation6 + $0x60] sm:$0xff]  ;;  %v811_v56 = vld [vmem:[#allocation6 + $0x2e8] sm:$0x1f] }
  0xd9   :  { %847 = vmatpush.msrb.mxu3 %v747_v21  ;;  %825 = vmatpush.msrb.mxu2 %v730_v32  ;;  %v796_v21 = vld [vmem:[#allocation6 + $0x270] sm:$0xff]  ;;  %v763_v32 = vld [vmem:[#allocation6 + $0x168] sm:$0xff] }
  0xda   :  { %535 = vmatpush.msrb.mxu0 %v1350_v1  ;;  %558 = vmatpush.msrb.mxu1 %v1381_v9 }
  0xdb   :  { %990 = vmatmul.msk.f32.vlgmr.msrb.gmra.mxu0 %vm421_vm8, %v1470_v16  ;;  %992 = vmatmul.msk.f32.vlgmr.msrb.gmra.mxu1 %vm421_vm8, %v1470_v16 }
  0xe3   :  { %991 = vmatmul.msk.f32.gmra.mxu0 %vm421_vm8, %v1488_v31  ;;  %993 = vmatmul.msk.f32.gmra.mxu1 %vm421_vm8, %v1488_v31 }
 0x10b   :  { %v419_v14 = vpop.permute.xlu0 %418 }
 0x11d   :  { %v414_v45 = vpop.permute.xlu2 %413 }
 0x122   :  { %v491_v34 = vpop.f32.mrf.mxu2 }
 0x123   :  { %v1596_v63 = vadd.f32 %v491_v34, %v414_v45  ;;  %v746_v34 = vld [vmem:[#allocation6 + $0xe0] sm:$0xff] }
 0x124   :  { %848 = vmatpush.msrb.mxu3 %v746_v34  ;;  %v779_v34 = vld [vmem:[#allocation6 + $0x1e8] sm:$0xff] }
 0x125   :  { %v568_v16 = vmax.f32 %v1596_v63, 0.0  ;;  %v726_v63 = vld [vmem:[#allocation6 + $0x40] sm:$0xff] }
 0x12a   :  { %v494_v10 = vpop.f32.mrf.mxu2 }
 0x12b   :  { %v1611_v23 = vadd.f32 %v494_v10, %v419_v14 }
 0x12d   :  { %v574_v25 = vmax.f32 %v1611_v23, 0.0 }
 0x13f   :  { %v445_v48 = vpop.f32.mrf.mxu0 }
 0x140   :  { %v446_v59 = vadd.f32 %v445_v48, %v414_v45  ;;  %v468_v60 = vpop.f32.mrf.mxu1 }
 0x141   :  { %v469_v1 = vadd.f32 %v468_v60, %v414_v45 }
 0x142   :  { %v566_v9 = vmax.f32 %v446_v59, 0.0 }
 0x143   :  { %v567_v3 = vmax.f32 %v469_v1, 0.0  ;;  %v729_v1 = vld [vmem:[#allocation6 + $0x58] sm:$0xff] }
 0x144   :  { %v514_v4 = vpop.f32.mrf.mxu3  ;;  %826 = vmatpush.msrb.mxu2 %v729_v1  ;;  %v794_v1 = vld [vmem:[#allocation6 + $0x260] sm:$0xff] }
 0x145   :  { %v1175_v5 = vpack.i.bf16 %v567_v3, %v566_v9  ;;  %v1599_v8 = vadd.f32 %v514_v4, %v414_v45 }
 0x147   :  { %v569_v31 = vmax.f32 %v1599_v8, 0.0  ;;  %1176 = vrot.lane.b32.xlu1 %v1175_v5, %s1311_s8 }
 0x148   :  { %v448_v37 = vpop.f32.mrf.mxu0  ;;  %v471_v11 = vpop.f32.mrf.mxu1 }
 0x149   :  { %v1180_v22 = vpack.i.bf16 %v569_v31, %v568_v16  ;;  %v1607_v18 = vadd.f32 %v448_v37, %v419_v14  ;;  %v1609_v42 = vadd.f32 %v471_v11, %v419_v14  ;;  %v728_v11 = vld [vmem:[#allocation6 + $0x50] sm:$0xff] }
 0x14a   :  { %827 = vmatpush.msrb.mxu2 %v728_v11  ;;  %v793_v11 = vld [vmem:[#allocation6 + $0x258] sm:$0xff] }
 0x14b   :  { %v572_v24 = vmax.f32 %v1607_v18, 0.0  ;;  %v573_v2 = vmax.f32 %v1609_v42, 0.0  ;;  %1181 = vrot.lane.b32.xlu2 %v1180_v22, %s1311_s8  ;;  %v744_v22 = vld [vmem:[#allocation6 + $0xd0] sm:$0xff]  ;;  %v725_v18 = vld [vmem:[#allocation6 + $0x38] sm:$0xff] }
 0x14c   :  { %v517_v27 = vpop.f32.mrf.mxu3 }
 0x14d   :  { %v1185_v46 = vpack.i.bf16 %v573_v2, %v572_v24  ;;  %v1621_v50 = vadd.f32 %v517_v27, %v419_v14  ;;  %v743_v27 = vld [vmem:[#allocation6 + $0xc8] sm:$0xff] }
 0x14f   :  { %v575_v54 = vmax.f32 %v1621_v50, 0.0  ;;  %1186 = vrot.lane.b32.xlu1 %v1185_v46, %s1311_s8  ;;  %v724_v46 = vld [vmem:[#allocation6 + $0x30] sm:$0xff]  ;;  %v738_v50 = vld [vmem:[#allocation6 + $0xa0] sm:$0xff] }
 0x151   :  { %v1190_v26 = vpack.i.bf16 %v575_v54, %v574_v25 }
 0x153   :  { %1191 = vrot.lane.b32.xlu2 %v1190_v26, %s1311_s8 }
 0x158   :  { %v537_v29 = vpop.f32.mrf.mxu0  ;;  %v560_v0 = vpop.f32.mrf.mxu1 }
 0x159   :  { %v1630_v6 = vadd.f32 %v537_v29, %v414_v45  ;;  %v1632_v7 = vadd.f32 %v560_v0, %v414_v45  ;;  %v723_v0 = vld [vmem:[#allocation6 + $0x28] sm:$0xff] }
 0x15b   :  { %v570_v35 = vmax.f32 %v1630_v6, 0.0  ;;  %v571_v28 = vmax.f32 %v1632_v7, 0.0 }
 0x15d   :  { %598 = vrot.lane.b32.xlu0 %v570_v35, %s1311_s8  ;;  %600 = vrot.lane.b32.xlu1 %v571_v28, %s1311_s8 }
 0x160   :  { %v540_v36 = vpop.f32.mrf.mxu0  ;;  %v563_v30 = vpop.f32.mrf.mxu1 }
 0x161   :  { %v1642_v17 = vadd.f32 %v540_v36, %v419_v14  ;;  %v1644_v19 = vadd.f32 %v563_v30, %v419_v14 }
 0x163   :  { %v576_v38 = vmax.f32 %v1642_v17, 0.0  ;;  %v577_v39 = vmax.f32 %v1644_v19, 0.0  ;;  %v737_v17 = vld [vmem:[#allocation6 + $0x98] sm:$0xff]  ;;  %v719_v19 = vld [vmem:[#allocation6 + $0x8] sm:$0xff] }
 0x165   :  { %610 = vrot.lane.b32.xlu2 %v576_v38, %s1311_s8  ;;  %612 = vrot.lane.b32.xlu0 %v577_v39, %s1311_s8 }
 0x1a5   :  { %v1654_v40 = vpop.permute.xlu2 %1181 }
 0x1a6   :  { %v1183_v41 = vunpack.i.l.bf16 %v1654_v40  ;;  %v1184_v62 = vunpack.i.h.bf16 %v1654_v40 }
 0x1a8   :  { %v616_v45 = vsel %vm69_vm7, %v1183_v41, %v1184_v62 }
 0x1a9   :  { %v1687_v10 = vmax.f32 %v568_v16, %v616_v45  ;;  %v742_v16 = vld [vmem:[#allocation6 + $0xc0] sm:$0xff]  ;;  %v795_v45 = vld [vmem:[#allocation6 + $0x268] sm:$0xff] }
 0x1ad   :  { %v1657_v49 = vpop.permute.xlu2 %1191 }
 0x1ae   :  { %v1194_v13 = vunpack.i.h.bf16 %v1657_v49  ;;  %v1193_v33 = vunpack.i.l.bf16 %v1657_v49 }
 0x1b0   :  { %v621_v48 = vsel %vm69_vm7, %v1193_v33, %v1194_v13 }
 0x1b1   :  { %v1683_v14 = vmax.f32 %v574_v25, %v621_v48  ;;  %v740_v25 = vld [vmem:[#allocation6 + $0xb0] sm:$0xff]  ;;  %v809_v48 = vld [vmem:[#allocation6 + $0x2d8] sm:$0xff] }
 0x1b9   :  { %v1177_v12 = vpop.permute.xlu1 %1176 }
 0x1ba   :  { %v1179_v15 = vunpack.i.h.bf16 %v1177_v12  ;;  %v1178_v44 = vunpack.i.l.bf16 %v1177_v12  ;;  %v739_v12 = vld [vmem:[#allocation6 + $0xa8] sm:$0xff] }
 0x1bc   :  { %v615_v43 = vsel %vm69_vm7, %v1179_v15, %v1183_v41  ;;  %v614_v47 = vsel %vm69_vm7, %v1178_v44, %v1179_v15 }
 0x1bd   :  { %v1661_v51 = vmax.f32 %v566_v9, %v614_v47  ;;  %v1663_v52 = vmax.f32 %v567_v3, %v615_v43  ;;  %v745_v9 = vld [vmem:[#allocation6 + $0xd8] sm:$0xff]  ;;  %v722_v47 = vld [vmem:[#allocation6 + $0x20] sm:$0xff] }
 0x1be   :  { %849 = vmatpush.msrb.mxu3 %v745_v9  ;;  %v808_v9 = vld [vmem:[#allocation6 + $0x2d0] sm:$0xff] }
 0x1bf   :  { %v1195_v57 = vpack.i.bf16 %v1663_v52, %v1661_v51  ;;  %v611_v44 = vpop.permute.xlu2 %610 }
 0x1c0   :  { %850 = vmatpush.msrb.mxu3 %v744_v22  ;;  %v622_v8 = vsel %vm69_vm7, %v1194_v13, %v611_v44  ;;  %v781_v13 = vld [vmem:[#allocation6 + $0x1f8] sm:$0xff]  ;;  %v807_v22 = vld [vmem:[#allocation6 + $0x2c8] sm:$0xff] }
 0x1c1   :  { %v1187_v58 = vpop.permute.xlu1 %1186  ;;  %1196 = vrot.lane.b32.xlu1 %v1195_v57, %s1309_s6  ;;  %891 = vmatpush.msra.mxu1 %v781_v13  ;;  %v764_v57 = vld [vmem:[#allocation6 + $0x170] sm:$0xff] }
 0x1c2   :  { %v1189_v59 = vunpack.i.h.bf16 %v1187_v58  ;;  %v1188_v60 = vunpack.i.l.bf16 %v1187_v58  ;;  %851 = vmatpush.msrb.mxu3 %v743_v27  ;;  %v810_v58 = vld [vmem:[#allocation6 + $0x2e0] sm:$0xff]  ;;  %v768_v13 = vld [vmem:[#allocation6 + $0x190] sm:$0xff] }
 0x1c3   :  { %892 = vmatpush.msra.mxu1 %v780_v20  ;;  %v806_v27 = vld [vmem:[#allocation6 + $0x2c0] sm:$0xff]  ;;  %v767_v20 = vld [vmem:[#allocation6 + $0x188] sm:$0xff] }
 0x1c4   :  { %v620_v3 = vsel %vm69_vm7, %v1189_v59, %v1193_v33  ;;  %v619_v4 = vsel %vm69_vm7, %v1188_v60, %v1189_v59  ;;  %852 = vmatpush.msrb.mxu3 %v742_v16  ;;  %v797_v33 = vld [vmem:[#allocation6 + $0x278] sm:$0xff]  ;;  %v762_v59 = vld [vmem:[#allocation6 + $0x160] sm:$0xff]  ;;  %v775_v16 = vld [vmem:[#allocation6 + $0x1c8] sm:$0xff] }
 0x1c5   :  { %v1679_v5 = vmax.f32 %v573_v2, %v620_v3  ;;  %v1691_v37 = vmax.f32 %v572_v24, %v619_v4  ;;  %v727_v2 = vld [vmem:[#allocation6 + $0x48] sm:$0xff]  ;;  %v741_v24 = vld [vmem:[#allocation6 + $0xb8] sm:$0xff]  ;;  %893 = vmatpush.msra.mxu1 %v779_v34  ;;  %v778_v60 = vld [vmem:[#allocation6 + $0x1e0] sm:$0xff] }
 0x1c6   :  { %828 = vmatpush.msrb.mxu2 %v727_v2  ;;  %853 = vmatpush.msrb.mxu3 %v741_v24  ;;  %v761_v3 = vld [vmem:[#allocation6 + $0x158] sm:$0xff]  ;;  %v792_v2 = vld [vmem:[#allocation6 + $0x250] sm:$0xff]  ;;  %v782_v34 = vld [vmem:[#allocation6 + $0x200] sm:$0xff] }
 0x1c7   :  { %v1205_v42 = vpack.i.bf16 %v1683_v14, %v1679_v5  ;;  %v1200_v23 = vpack.i.bf16 %v1691_v37, %v1687_v10  ;;  %894 = vmatpush.msra.mxu1 %v778_v60  ;;  %v777_v4 = vld [vmem:[#allocation6 + $0x1d8] sm:$0xff] }
 0x1c8   :  { %829 = vmatpush.msrb.mxu2 %v726_v63  ;;  %854 = vmatpush.msrb.mxu3 %v740_v25  ;;  %v759_v63 = vld [vmem:[#allocation6 + $0x148] sm:$0xff]  ;;  %v805_v24 = vld [vmem:[#allocation6 + $0x2b8] sm:$0xff]  ;;  %v774_v25 = vld [vmem:[#allocation6 + $0x1c0] sm:$0xff] }
 0x1c9   :  { %1206 = vrot.lane.b32.xlu0 %v1205_v42, %s1309_s6  ;;  %1201 = vrot.lane.b32.xlu2 %v1200_v23, %s1309_s6  ;;  %v760_v42 = vld [vmem:[#allocation6 + $0x150] sm:$0xff] }
 0x1ca   :  { %830 = vmatpush.msrb.mxu2 %v725_v18  ;;  %855 = vmatpush.msrb.mxu3 %v739_v12  ;;  %v776_v23 = vld [vmem:[#allocation6 + $0x1d0] sm:$0xff]  ;;  %v791_v18 = vld [vmem:[#allocation6 + $0x248] sm:$0xff] }
 0x1cb   :  { %895 = vmatpush.msra.mxu1 %v777_v4  ;;  %v803_v12 = vld [vmem:[#allocation6 + $0x2a8] sm:$0xff] }
 0x1cc   :  { %831 = vmatpush.msrb.mxu2 %v724_v46  ;;  %856 = vmatpush.msrb.mxu3 %v738_v50  ;;  %v758_v46 = vld [vmem:[#allocation6 + $0x140] sm:$0xff]  ;;  %v801_v50 = vld [vmem:[#allocation6 + $0x298] sm:$0xff] }
 0x1cd   :  { %896 = vmatpush.msra.mxu1 %v776_v23 }
 0x1ce   :  { %832 = vmatpush.msrb.mxu2 %v723_v0  ;;  %857 = vmatpush.msrb.mxu3 %v737_v17  ;;  %v757_v0 = vld [vmem:[#allocation6 + $0x138] sm:$0xff]  ;;  %v770_v17 = vld [vmem:[#allocation6 + $0x1a0] sm:$0xff] }
 0x1cf   :  { %v599_v26 = vpop.permute.xlu0 %598  ;;  %v601_v29 = vpop.permute.xlu1 %600  ;;  %897 = vmatpush.msra.mxu1 %v775_v16 }
 0x1d0   :  { %v617_v36 = vsel %vm69_vm7, %v1184_v62, %v599_v26  ;;  %v618_v30 = vsel %vm69_vm7, %v599_v26, %v601_v29  ;;  %v1703_v40 = vmax.f32 %v571_v28, %v601_v29  ;;  %833 = vmatpush.msrb.mxu2 %v722_v47  ;;  %858 = vmatpush.msrb.mxu3 %v736_v53  ;;  %v765_v62 = vld [vmem:[#allocation6 + $0x178] sm:$0xff]  ;;  %v790_v26 = vld [vmem:[#allocation6 + $0x240] sm:$0xff]  ;;  %v804_v29 = vld [vmem:[#allocation6 + $0x2b0] sm:$0xff] }
 0x1d1   :  { %v1707_v41 = vmax.f32 %v569_v31, %v617_v36  ;;  %v1711_v15 = vmax.f32 %v570_v35, %v618_v30  ;;  %v1724_v35 = vmax.f32 %v575_v54, %v622_v8  ;;  %v721_v54 = vld [vmem:[#allocation6 + $0x18] sm:$0xff]  ;;  %868 = vmatpush.msra.mxu0 %v765_v62  ;;  %898 = vmatpush.msra.mxu1 %v774_v25  ;;  %v788_v8 = vld [vmem:[#allocation6 + $0x230] sm:$0xff]  ;;  %v787_v47 = vld [vmem:[#allocation6 + $0x228] sm:$0xff] }
 0x1d2   :  { %670 = vrot.lane.b32.xlu2 %v1703_v40, %s1309_s6  ;;  %834 = vmatpush.msrb.mxu2 %v721_v54  ;;  %v773_v36 = vld [vmem:[#allocation6 + $0x1b8] sm:$0xff]  ;;  %v754_v54 = vld [vmem:[#allocation6 + $0x120] sm:$0xff]  ;;  %v800_v53 = vld [vmem:[#allocation6 + $0x290] sm:$0xff] }
 0x1d3   :  { %v1210_v7 = vpack.i.bf16 %v1707_v41, %v1711_v15  ;;  %869 = vmatpush.msra.mxu0 %v764_v57  ;;  %v789_v30 = vld [vmem:[#allocation6 + $0x238] sm:$0xff]  ;;  %899 = vmatpush.msra.mxu1 %v773_v36  ;;  %v752_v62 = vld [vmem:[#allocation6 + $0x110] sm:$0xff]  ;;  %v751_v57 = vld [vmem:[#allocation6 + $0x108] sm:$0xff] }
 0x1d5   :  { %1211 = vrot.lane.b32.xlu1 %v1210_v7, %s1309_s6  ;;  %870 = vmatpush.msra.mxu0 %v763_v32  ;;  %v772_v7 = vld [vmem:[#allocation6 + $0x1b0] sm:$0xff]  ;;  %v766_v32 = vld [vmem:[#allocation6 + $0x180] sm:$0xff] }
 0x1d6   :  { %900 = vmatpush.msra.mxu1 %v772_v7 }
 0x1d7   :  { %v613_v31 = vpop.permute.xlu0 %612  ;;  %871 = vmatpush.msra.mxu0 %v762_v59 }
 0x1d8   :  { %v623_v6 = vsel %vm69_vm7, %v611_v44, %v613_v31  ;;  %v1732_v43 = vmax.f32 %v577_v39, %v613_v31  ;;  %v735_v39 = vld [vmem:[#allocation6 + $0x88] sm:$0xff]  ;;  %v756_v44 = vld [vmem:[#allocation6 + $0x130] sm:$0xff]  ;;  %v802_v31 = vld [vmem:[#allocation6 + $0x2a0] sm:$0xff] }
 0x1d9   :  { %v1728_v28 = vmax.f32 %v576_v38, %v623_v6  ;;  %v720_v38 = vld [vmem:[#allocation6 + $0x10] sm:$0xff]  ;;  %859 = vmatpush.msrb.mxu3 %v735_v39  ;;  %872 = vmatpush.msra.mxu0 %v761_v3  ;;  %v755_v6 = vld [vmem:[#allocation6 + $0x128] sm:$0xff]  ;;  %v769_v39 = vld [vmem:[#allocation6 + $0x198] sm:$0xff] }
 0x1da   :  { %835 = vmatpush.msrb.mxu2 %v720_v38  ;;  %v786_v38 = vld [vmem:[#allocation6 + $0x220] sm:$0xff] }
 0x1db   :  { %v1215_v49 = vpack.i.bf16 %v1724_v35, %v1728_v28  ;;  %860 = vmatpush.msrb.mxu3 %v734_v61  ;;  %873 = vmatpush.msra.mxu0 %v760_v42  ;;  %v799_v61 = vld [vmem:[#allocation6 + $0x288] sm:$0xff] }
 0x1dc   :  { %836 = vmatpush.msrb.mxu2 %v719_v19  ;;  %v753_v19 = vld [vmem:[#allocation6 + $0x118] sm:$0xff] }
 0x1dd   :  { %1216 = vrot.lane.b32.xlu0 %v1215_v49, %s1309_s6  ;;  %682 = vrot.lane.b32.xlu1 %v1732_v43, %s1309_s6  ;;  %v771_v49 = vld [vmem:[#allocation6 + $0x1a8] sm:$0xff] }
 0x1de   :  { %837 = vmatpush.msrb.mxu2 %v718_v55  ;;  %994 = vmatpush.msk.msra.mxu3 %vm818_vm9, %v811_v56  ;;  %v785_v55 = vld [vmem:[#allocation6 + $0x218] sm:$0xff]  ;;  %v798_v56 = vld [vmem:[#allocation6 + $0x280] sm:$0xff] }
 0x1df   :  { %874 = vmatpush.msra.mxu0 %v759_v63  ;;  %901 = vmatpush.msra.mxu1 %v771_v49 }
 0x1e0   :  { %914 = vmatpush.msra.mxu2 %v797_v33  ;;  %940 = vmatpush.msra.mxu3 %v810_v58  ;;  %v784_v33 = vld [vmem:[#allocation6 + $0x210] sm:$0xff]  ;;  %v750_v58 = vld [vmem:[#allocation6 + $0x100] sm:$0xff] }
 0x1e1   :  { %875 = vmatpush.msra.mxu0 %v758_v46  ;;  %902 = vmatpush.msra.mxu1 %v770_v17 }
 0x1e2   :  { %915 = vmatpush.msra.mxu2 %v796_v21  ;;  %941 = vmatpush.msra.mxu3 %v809_v48  ;;  %v783_v21 = vld [vmem:[#allocation6 + $0x208] sm:$0xff] }
 0x1e3   :  { %876 = vmatpush.msra.mxu0 %v757_v0  ;;  %903 = vmatpush.msra.mxu1 %v769_v39 }
 0x1e4   :  { %916 = vmatpush.msra.mxu2 %v795_v45  ;;  %942 = vmatpush.msra.mxu3 %v808_v9 }
 0x1e5   :  { %877 = vmatpush.msra.mxu0 %v756_v44  ;;  %904 = vmatpush.msra.mxu1 %v768_v13 }
 0x1e6   :  { %917 = vmatpush.msra.mxu2 %v794_v1  ;;  %943 = vmatpush.msra.mxu3 %v807_v22 }
 0x1e7   :  { %878 = vmatpush.msra.mxu0 %v755_v6  ;;  %905 = vmatpush.msra.mxu1 %v767_v20 }
 0x1e8   :  { %918 = vmatpush.msra.mxu2 %v793_v11  ;;  %944 = vmatpush.msra.mxu3 %v806_v27 }
 0x1e9   :  { %879 = vmatpush.msra.mxu0 %v754_v54  ;;  %906 = vmatpush.msra.mxu1 %v766_v32 }
 0x1ea   :  { %919 = vmatpush.msra.mxu2 %v792_v2  ;;  %945 = vmatpush.msra.mxu3 %v805_v24 }
 0x1eb   :  { %880 = vmatpush.msra.mxu0 %v753_v19 }
 0x1ec   :  { %920 = vmatpush.msra.mxu2 %v791_v18  ;;  %946 = vmatpush.msra.mxu3 %v804_v29 }
 0x1ed   :  { %881 = vmatpush.msra.mxu0 %v752_v62 }
 0x1ee   :  { %921 = vmatpush.msra.mxu2 %v790_v26  ;;  %947 = vmatpush.msra.mxu3 %v803_v12 }
 0x1ef   :  { %882 = vmatpush.msra.mxu0 %v751_v57 }
 0x1f0   :  { %922 = vmatpush.msra.mxu2 %v789_v30  ;;  %948 = vmatpush.msra.mxu3 %v802_v31 }
 0x1f1   :  { %883 = vmatpush.msra.mxu0 %v750_v58 }
 0x1f2   :  { %923 = vmatpush.msra.mxu2 %v788_v8  ;;  %949 = vmatpush.msra.mxu3 %v801_v50 }
 0x1f4   :  { %924 = vmatpush.msra.mxu2 %v787_v47  ;;  %950 = vmatpush.msra.mxu3 %v800_v53 }
 0x1f6   :  { %925 = vmatpush.msra.mxu2 %v786_v38  ;;  %951 = vmatpush.msra.mxu3 %v799_v61 }
 0x1f8   :  { %926 = vmatpush.msra.mxu2 %v785_v55  ;;  %952 = vmatpush.msra.mxu3 %v798_v56 }
 0x1fa   :  { %927 = vmatpush.msra.mxu2 %v784_v33 }
 0x1fc   :  { %928 = vmatpush.msra.mxu2 %v783_v21 }
 0x1fe   :  { %929 = vmatpush.msra.mxu2 %v782_v34 }
 0x223   :  { %v1202_v45 = vpop.permute.xlu2 %1201 }
 0x224   :  { %v1203_v59 = vunpack.i.l.bf16 %v1202_v45  ;;  %v1204_v42 = vunpack.i.h.bf16 %v1202_v45 }
 0x22c   :  { %v671_v24 = vpop.permute.xlu2 %670 }
 0x233   :  { %v1197_v48 = vpop.permute.xlu1 %1196 }
 0x234   :  { %v1199_v60 = vunpack.i.h.bf16 %v1197_v48  ;;  %v1198_v1 = vunpack.i.l.bf16 %v1197_v48 }
 0x236   :  { %v684_v9 = vsel %vm105_vm5, %v1198_v1, %v1199_v60  ;;  %v685_v3 = vsel %vm105_vm5, %v1199_v60, %v1203_v59 }
 0x237   :  { %v706_v4 = vmax.f32 %v1661_v51, %v684_v9  ;;  %v707_v11 = vmax.f32 %v1663_v52, %v685_v3  ;;  %v711_v51 = vmax.f32 %v1703_v40, %v671_v24 }
 0x239   :  { %838 = vmatmul.f32.vlgmr.msrb.gmra.mxu2 %v706_v4  ;;  %861 = vmatmul.f32.vlgmr.msrb.gmra.mxu3 %v707_v11 }
 0x23b   :  { %v1207_v22 = vpop.permute.xlu0 %1206 }
 0x23c   :  { %v1209_v23 = vunpack.i.h.bf16 %v1207_v22  ;;  %v1208_v2 = vunpack.i.l.bf16 %v1207_v22 }
 0x23e   :  { %v689_v27 = vsel %vm105_vm5, %v1204_v42, %v1208_v2  ;;  %v690_v63 = vsel %vm105_vm5, %v1208_v2, %v1209_v23 }
 0x23f   :  { %v712_v16 = vmax.f32 %v1691_v37, %v689_v27  ;;  %v713_v18 = vmax.f32 %v1679_v5, %v690_v63 }
 0x241   :  { %841 = vmatmul.f32.gmra.mxu2 %v712_v16  ;;  %864 = vmatmul.f32.gmra.mxu3 %v713_v18 }
 0x247   :  { %v1212_v52 = vpop.permute.xlu1 %1211 }
 0x248   :  { %v1214_v46 = vunpack.i.h.bf16 %v1212_v52  ;;  %v1213_v25 = vunpack.i.l.bf16 %v1212_v52 }
 0x249   :  { %995 = vmatmul.msk.f32.vlgmr.msra.gmra.mxu3 %vm123_vm4, %v711_v51 }
 0x24a   :  { %v686_v26 = vsel %vm105_vm5, %v1203_v59, %v1214_v46  ;;  %v687_v29 = vsel %vm105_vm5, %v1214_v46, %v1213_v25  ;;  %v688_v0 = vsel %vm105_vm5, %v1213_v25, %v671_v24 }
 0x24b   :  { %v708_v37 = vmax.f32 %v1687_v10, %v686_v26  ;;  %v709_v5 = vmax.f32 %v1707_v41, %v687_v29  ;;  %v710_v36 = vmax.f32 %v1711_v15, %v688_v0 }
 0x24d   :  { %884 = vmatmul.f32.vlgmr.msra.gmra.mxu0 %v708_v37  ;;  %907 = vmatmul.f32.vlgmr.msra.gmra.mxu1 %v709_v5 }
 0x24e   :  { %930 = vmatmul.f32.vlgmr.msra.gmra.mxu2 %v710_v36 }
 0x24f   :  { %v1217_v40 = vpop.permute.xlu0 %1216  ;;  %v683_v30 = vpop.permute.xlu1 %682 }
 0x250   :  { %v1219_v12 = vunpack.i.h.bf16 %v1217_v40  ;;  %v1218_v44 = vunpack.i.l.bf16 %v1217_v40  ;;  %v717_v7 = vmax.f32 %v1732_v43, %v683_v30 }
 0x252   :  { %v693_v8 = vsel %vm105_vm5, %v1218_v44, %v683_v30  ;;  %996 = vmatmul.msk.f32.gmra.mxu3 %vm123_vm4, %v717_v7  ;;  %v691_v31 = vsel %vm105_vm5, %v1209_v23, %v1219_v12  ;;  %v692_v10 = vsel %vm105_vm5, %v1219_v12, %v1218_v44 }
 0x253   :  { %v714_v41 = vmax.f32 %v1683_v14, %v691_v31  ;;  %v715_v15 = vmax.f32 %v1724_v35, %v692_v10  ;;  %v716_v6 = vmax.f32 %v1728_v28, %v693_v8 }
 0x255   :  { %887 = vmatmul.f32.gmra.mxu0 %v714_v41  ;;  %910 = vmatmul.f32.gmra.mxu1 %v715_v15 }
 0x256   :  { %933 = vmatmul.f32.gmra.mxu2 %v716_v6 }
 0x2bc   :  { %v862_v49 = vpop.f32.mrf.mxu3  ;;  %v839_v47 = vpop.f32.mrf.mxu2 }
 0x2bd   :  { %v863_v54 = vadd.f32 %v862_v49, %v839_v47 }
 0x2c4   :  { %v865_v43 = vpop.f32.mrf.mxu3  ;;  %v842_v50 = vpop.f32.mrf.mxu2 }
 0x2c5   :  { %v866_v61 = vadd.f32 %v865_v43, %v842_v50 }
 0x2ca   :  { %v885_v17 = vpop.f32.mrf.mxu0  ;;  %v908_v53 = vpop.f32.mrf.mxu1 }
 0x2cb   :  { %v886_v38 = vadd.f32 %v885_v17, %v863_v54 }
 0x2cc   :  { %v954_v39 = vpop.f32.mrf.mxu3 }
 0x2cd   :  { %v909_v19 = vadd.f32 %v908_v53, %v886_v38 }
 0x2d1   :  { %v931_v55 = vpop.f32.mrf.mxu2 }
 0x2d2   :  { %v932_v14 = vadd.f32 %v931_v55, %v909_v19  ;;  %v888_v62 = vpop.f32.mrf.mxu0  ;;  %v911_v28 = vpop.f32.mrf.mxu1 }
 0x2d3   :  { %v889_v13 = vadd.f32 %v888_v62, %v866_v61 }
 0x2d4   :  { %v955_v35 = vadd.f32 %v954_v39, %v932_v14 }
 0x2d5   :  { %v912_v33 = vadd.f32 %v911_v28, %v889_v13  ;;  %v957_v20 = vpop.f32.mrf.mxu3 }
 0x2d6   :  { %960 = vst [vmem:[#allocation8] sm:$0xff] %v955_v35 }
 0x2d9   :  { %v934_v56 = vpop.f32.mrf.mxu2 }
 0x2da   :  { %v935_v57 = vadd.f32 %v934_v56, %v912_v33 }
 0x2dc   :  { %v958_v21 = vadd.f32 %v957_v20, %v935_v57 }
 0x2de   :  { %961 = vst [vmem:[#allocation8 + $0x8] sm:$0xff] %v958_v21 }
 0x2df   :  { %974 = dma.vmem_to_hbm [thread:$0]  %s967_s16, 256, %s969_s19, [#allocation5], %s1302_s27, %s1302_s27, %s1303_s28  }
 0x2e0   :  { %1296 = dma.done.wait [#allocation5], 256  }
 0x2e1   :  { %1297 = vsyncadd [#allocation5], 4294967040 }
 0x2e2   :  { %979 = vsyncpa [#allocation4], 1 }
 0x2e3   :  { %980 = vsyncpa [#allocation7], 1 }
 0x2e4   :  { %981 = vsyncpa [#allocation5], 1 }

</bundles_post_ra>
